<compile_context>
chip_gen: v6e
topology: v6e:2x2x1
jax: 0.10.0
libtpu: 0.0.40
codegen_flags: <defaults>
</compile_context>

<pallas_src>
import functools
import math

import jax
import jax.numpy as jnp
from jax import lax
from jax.experimental import pallas as pl
from jax.experimental.pallas import tpu as pltpu

_MIB = 1 << 20


# --------------------------------------------------------------------------- #
# Kernels
# --------------------------------------------------------------------------- #
def _ffn_resident_kernel(x_ref, w1_ref, b1_ref, w2_ref, b2_ref, o_ref):
    """o = relu(x @ W1^T + b1) @ W2^T + b2, full weights resident in VMEM.

    x_ref: (tm, D)   w1_ref: (F, D)   b1_ref: (1, F)
    w2_ref: (D, F)   b2_ref: (1, D)   o_ref: (tm, D)
    """
    h = lax.dot_general(
        x_ref[...], w1_ref[...],
        dimension_numbers=(((1,), (1,)), ((), ())),
        preferred_element_type=jnp.float32,
    )
    h = jnp.maximum(h + b1_ref[...], 0.0)
    # TODO(synk): training-mode dropout (pltpu.prng_*) not implemented; this
    # matches the module in eval() mode where dropout is the identity.
    o = lax.dot_general(
        h.astype(w2_ref.dtype), w2_ref[...],
        dimension_numbers=(((1,), (1,)), ((), ())),
        preferred_element_type=jnp.float32,
    )
    o_ref[...] = (o + b2_ref[...]).astype(o_ref.dtype)


def _ffn_streamed_kernel(x_ref, w1_ref, b1_ref, w2_ref, b2_ref, o_ref,
                         *scratch, t_ff):
    """Fused FFN with the ff axis as innermost reduction.

    x_ref:  (tm, D)      w1_ref: (t_ff, D)   b1_ref: (1, F) resident
    w2_ref: (D, t_ff)    b2_ref: (1, D)      o_ref:  (tm, D)
    scratch: optional (tm, D) f32 accumulator; for f32 outputs the accumulator
    IS o_ref itself (resident across the f axis), saving tm*D*4 bytes of VMEM.
    """
    f = pl.program_id(1)
    acc_ref = scratch[0] if scratch else o_ref

    @pl.when(f == 0)
    def _():
        acc_ref[...] = jnp.zeros(acc_ref.shape, acc_ref.dtype)

    # h = relu(x_tile @ W1_block^T + b1_block)  -> (tm, t_ff), f32 on the MXU.
    h = lax.dot_general(
        x_ref[...], w1_ref[...],
        dimension_numbers=(((1,), (1,)), ((), ())),
        preferred_element_type=jnp.float32,
    )
    if t_ff == b1_ref.shape[1]:
        b1_blk = b1_ref[...]
    else:
        start = f * t_ff
        if t_ff % 128 == 0:
            start = pl.multiple_of(start, 128)
        b1_blk = b1_ref[:, pl.ds(start, t_ff)]
    h = jnp.maximum(h + b1_blk, 0.0)
    # TODO(synk): training-mode dropout not implemented (eval(): identity).

    # acc += h @ W2_block^T  -> (tm, D); the (M, ff) hidden never leaves VMEM.
    acc_ref[...] += lax.dot_general(
        h.astype(w2_ref.dtype), w2_ref[...],
        dimension_numbers=(((1,), (1,)), ((), ())),
        preferred_element_type=jnp.float32,
    )

    @pl.when(f == pl.num_programs(1) - 1)
    def _():
        o_ref[...] = (acc_ref[...] + b2_ref[...]).astype(o_ref.dtype)


# --------------------------------------------------------------------------- #
# Tile / VMEM selection
# --------------------------------------------------------------------------- #
def _round_up(x, m):
    return ((x + m - 1) // m) * m


def _pick_t_ff(F, max_t):
    """Largest 128-aligned divisor of F that is <= max_t; falls back to F."""
    if F <= max_t:
        return F
    t = (max_t // 128) * 128
    while t >= 128:
        if F % t == 0:
            return t
        t -= 128
    return F


def _footprint_bytes(tm, t_ff, D, F, cbytes, out_bytes, use_scratch):
    # Double-buffered pipeline blocks + resident biases + optional f32 acc.
    buffered = 2 * (tm * D * cbytes          # x tile
                    + t_ff * D * cbytes      # W1 block
                    + D * t_ff * cbytes      # W2 block
                    + tm * D * out_bytes)    # output tile
    biases = 2 * (F + D) * 4
    scratch = tm * D * 4 if use_scratch else 0
    return buffered + biases + scratch


def _vmem_capacity():
    try:
        info = pltpu.get_tpu_info()
        cap = getattr(info, "vmem_capacity_bytes", None)
        if cap:
            return int(cap)
    except Exception:
        pass
    return 64 * _MIB   # conservative default (v7x per-core VMEM)


def _select_tiles(M, D, F, cbytes, out_bytes, use_scratch, cap):
    budget = int(cap * 0.75)
    m_cap = _round_up(min(max(M, 1), 1024), 8)

    def fits(tm, t_ff):
        return _footprint_bytes(tm, t_ff, D, F, cbytes, out_bytes,
                                use_scratch) <= budget

    # Path A: full weights resident in VMEM -> weights stream from HBM once.
    if 2 * 2 * D * F * cbytes <= budget // 2:
        tm = m_cap
        while tm > 8 and not fits(tm, F):
            tm = max(8, _round_up(tm // 2, 8))
        if fits(tm, F):
            return True, tm, F

    # Path B: stream ff blocks. Weights are re-fetched once per M tile, so a
    # big tm is the lever that crosses each generation's HBM/MXU ridge.
    if cap <= 96 * _MIB:                       # v7x-class: 64 MiB VMEM, fast HBM
        prefs = [(512, 256), (384, 256), (256, 256), (256, 128), (128, 128)]
    else:                                      # v5e / v6e: 128 MiB VMEM
        prefs = [(768, 512), (768, 256), (512, 512), (512, 256),
                 (384, 256), (256, 256), (256, 128), (128, 128)]
    prefs += [(64, 128), (32, 128), (16, 128), (8, 128)]
    for tm_p, tff_p in prefs:
        tm = min(tm_p, m_cap)
        t_ff = _pick_t_ff(F, tff_p)
        if fits(tm, t_ff):
            return False, tm, t_ff
    return False, min(8, m_cap), _pick_t_ff(F, 128)


# --------------------------------------------------------------------------- #
# Wrapper
# --------------------------------------------------------------------------- #
def feed_forward_network(x, w1, b1, w2, b2, *, tm=None, t_ff=None,
                         compute_dtype=None):
    """FeedForwardNetwork forward (eval mode).

    x:  (..., d_model)
    w1: (ff_dim, d_model)  b1: (ff_dim,)      -- PyTorch nn.Linear layout
    w2: (d_model, ff_dim)  b2: (d_model,)
    compute_dtype: MXU operand dtype; defaults to bf16 for f32 inputs
                   (accumulation is always f32, output keeps x.dtype).
    """
    orig_shape = x.shape
    orig_dtype = x.dtype
    D = orig_shape[-1]
    F = w1.shape[0]
    assert w1.shape == (F, D), w1.shape
    assert w2.shape == (D, F), w2.shape
    M = int(math.prod(orig_shape[:-1]))

    # bf16 is MXU-native on v5e/v6e/v7x; f32 matmuls are multi-pass emulation.
    if compute_dtype is None:
        compute_dtype = jnp.bfloat16 if orig_dtype == jnp.float32 else orig_dtype

    x2d = x.reshape(M, D).astype(compute_dtype)
    w1c = w1.astype(compute_dtype)
    w2c = w2.astype(compute_dtype)
    b1_2d = b1.reshape(1, F).astype(jnp.float32)
    b2_2d = b2.reshape(1, D).astype(jnp.float32)

    cbytes = jnp.dtype(compute_dtype).itemsize
    out_bytes = jnp.dtype(orig_dtype).itemsize
    # f32 outputs accumulate directly into the resident output block.
    use_scratch = jnp.dtype(orig_dtype) != jnp.dtype(jnp.float32)

    cap = _vmem_capacity()
    small, tm_sel, tff_sel = _select_tiles(M, D, F, cbytes, out_bytes,
                                           use_scratch, cap)
    if tm is not None:
        tm_sel = _round_up(int(tm), 8)
    if t_ff is not None:
        tff_sel = int(t_ff)
        small = tff_sel >= F
    tm_sel = min(tm_sel, _round_up(M, 8))
    if not small:
        assert F % tff_sel == 0 and (tff_sel % 128 == 0 or tff_sel == F), \
            (F, tff_sel)

    # Pad M to a tile multiple (zero rows; sliced off after the call).
    M_pad = _round_up(M, tm_sel)
    if M_pad != M:
        x2d = jnp.pad(x2d, ((0, M_pad - M), (0, 0)))
    n_m_tiles = M_pad // tm_sel

    footprint = _footprint_bytes(tm_sel, F if small else tff_sel, D, F, cbytes,
                                 out_bytes, use_scratch and not small)
    vmem_limit = int(min(int(cap * 0.95), max(32 * _MIB, footprint + 8 * _MIB)))

    weight_passes = 1 if small else n_m_tiles
    cost = pl.CostEstimate(
        flops=int(4 * M_pad * D * F),            # two matmuls: 2*M*D*F each
        transcendentals=0,
        bytes_accessed=int(M_pad * D * cbytes                      # x
                           + weight_passes * 2 * F * D * cbytes    # W1+W2 streamed
                           + (F + D) * 4                           # biases
                           + M_pad * D * out_bytes),               # output
    )
    compiler_params = pltpu.CompilerParams(
        dimension_semantics=("parallel",) if small else ("parallel", "arbitrary"),
        vmem_limit_bytes=vmem_limit,
    )

    if small:
        out2d = pl.pallas_call(
            _ffn_resident_kernel,
            out_shape=jax.ShapeDtypeStruct((M_pad, D), orig_dtype),
            grid_spec=pltpu.PrefetchScalarGridSpec(
                num_scalar_prefetch=0,
                grid=(n_m_tiles,),
                in_specs=[
                    pl.BlockSpec((tm_sel, D), lambda i: (i, 0)),   # x tile
                    pl.BlockSpec((F, D), lambda i: (0, 0)),        # W1 resident
                    pl.BlockSpec((1, F), lambda i: (0, 0)),        # b1 resident
                    pl.BlockSpec((D, F), lambda i: (0, 0)),        # W2 resident
                    pl.BlockSpec((1, D), lambda i: (0, 0)),        # b2 resident
                ],
                out_specs=pl.BlockSpec((tm_sel, D), lambda i: (i, 0)),
            ),
            compiler_params=compiler_params,
            cost_estimate=cost,
        )(x2d, w1c, b1_2d, w2c, b2_2d)
    else:
        scratch = [pltpu.VMEM((tm_sel, D), jnp.float32)] if use_scratch else []
        kernel = functools.partial(_ffn_streamed_kernel, t_ff=tff_sel)
        out2d = pl.pallas_call(
            kernel,
            out_shape=jax.ShapeDtypeStruct((M_pad, D), orig_dtype),
            grid_spec=pltpu.PrefetchScalarGridSpec(
                num_scalar_prefetch=0,
                grid=(n_m_tiles, F // tff_sel),
                in_specs=[
                    pl.BlockSpec((tm_sel, D), lambda i, f: (i, 0)),    # x tile
                    pl.BlockSpec((tff_sel, D), lambda i, f: (f, 0)),   # W1 block
                    pl.BlockSpec((1, F), lambda i, f: (0, 0)),         # b1 resident
                    pl.BlockSpec((D, tff_sel), lambda i, f: (0, f)),   # W2 block
                    pl.BlockSpec((1, D), lambda i, f: (0, 0)),         # b2 resident
                ],
                out_specs=pl.BlockSpec((tm_sel, D), lambda i, f: (i, 0)),
                scratch_shapes=scratch,
            ),
            compiler_params=compiler_params,
            cost_estimate=cost,
        )(x2d, w1c, b1_2d, w2c, b2_2d)

    if M_pad != M:
        out2d = out2d[:M]
    return out2d.reshape(orig_shape)


# --------------------------------------------------------------------------- #
# Self-test
# --------------------------------------------------------------------------- #
if __name__ == "__main__":
    batch, seq, d_model, ff_dim = 2, 8, 32, 64

    key = jax.random.PRNGKey(0)
    kx, kw1, kb1, kw2, kb2 = jax.random.split(key, 5)

    # Deterministic init mimicking PyTorch nn.Linear: U(-1/sqrt(fan_in), +).
    bound1 = 1.0 / math.sqrt(d_model)
    w1 = jax.random.uniform(kw1, (ff_dim, d_model), jnp.float32, -bound1, bound1)
    b1 = jax.random.uniform(kb1, (ff_dim,), jnp.float32, -bound1, bound1)
    bound2 = 1.0 / math.sqrt(ff_dim)
    w2 = jax.random.uniform(kw2, (d_model, ff_dim), jnp.float32, -bound2, bound2)
    b2 = jax.random.uniform(kb2, (d_model,), jnp.float32, -bound2, bound2)

    x = jax.random.normal(kx, (batch, seq, d_model), jnp.float32)

    # Reference (eval mode: dropout is identity).
    ref = jnp.maximum(x @ w1.T + b1, 0.0) @ w2.T + b2

    # Default path: bf16 MXU compute, f32 accumulation, resident weights.
    out = jax.block_until_ready(feed_forward_network(x, w1, b1, w2, b2))
    assert out.shape == x.shape
    assert jnp.allclose(out, ref, atol=5e-2, rtol=5e-2), \
        float(jnp.max(jnp.abs(out - ref)))

    # Exact f32 compute path.
    out_f32 = jax.block_until_ready(
        feed_forward_network(x, w1, b1, w2, b2, compute_dtype=jnp.float32))
    assert jnp.allclose(out_f32, ref, atol=1e-5, rtol=1e-5)

    # Ragged M (padding path): M = 3*5 = 15 -> padded to 16.
    x_r = jax.random.normal(kx, (3, 5, d_model), jnp.float32)
    ref_r = jnp.maximum(x_r @ w1.T + b1, 0.0) @ w2.T + b2
    out_r = jax.block_until_ready(
        feed_forward_network(x_r, w1, b1, w2, b2, compute_dtype=jnp.float32))
    assert out_r.shape == x_r.shape
    assert jnp.allclose(out_r, ref_r, atol=1e-5, rtol=1e-5)

    # Streamed (ff-tiled) path with a multi-step reduction axis.
    d2, f2 = 32, 256
    kw1b, kb1b, kw2b, kb2b = jax.random.split(kw1, 4)
    bnd1 = 1.0 / math.sqrt(d2)
    w1b = jax.random.uniform(kw1b, (f2, d2), jnp.float32, -bnd1, bnd1)
    b1b = jax.random.uniform(kb1b, (f2,), jnp.float32, -bnd1, bnd1)
    bnd2 = 1.0 / math.sqrt(f2)
    w2b = jax.random.uniform(kw2b, (d2, f2), jnp.float32, -bnd2, bnd2)
    b2b = jax.random.uniform(kb2b, (d2,), jnp.float32, -bnd2, bnd2)
    xb = jax.random.normal(kx, (2, 12, d2), jnp.float32)
    ref_b = jnp.maximum(xb @ w1b.T + b1b, 0.0) @ w2b.T + b2b
    out_b = jax.block_until_ready(
        feed_forward_network(xb, w1b, b1b, w2b, b2b,
                             t_ff=128, compute_dtype=jnp.float32))
    assert out_b.shape == xb.shape
    assert jnp.allclose(out_b, ref_b, atol=1e-4, rtol=1e-4)

    print("KERNEL_OK")
</pallas_src>

<mosaic_0001>
module attributes {stable_mosaic.version = 11 : i64} {
  func.func @_ffn_resident_kernel(%arg0: i32, %arg1: memref<16x32xbf16, #tpu.memory_space<vmem>>, %arg2: memref<64x32xbf16, #tpu.memory_space<vmem>>, %arg3: memref<1x64xf32, #tpu.memory_space<vmem>>, %arg4: memref<32x64xbf16, #tpu.memory_space<vmem>>, %arg5: memref<1x32xf32, #tpu.memory_space<vmem>>, %arg6: memref<16x32xf32, #tpu.memory_space<vmem>>) attributes {dimension_semantics = [#tpu.dimension_semantics<parallel>], iteration_bounds = array<i64: 1>, scalar_prefetch = 0 : i64, scratch_operands = 0 : i64, tpu.core_type = #tpu.core_type<tc>, window_params = [{transform_indices = @transform_0, window_bounds = array<i64: 16, 32>}, {pipeline_mode = #tpu.pipeline_mode<synchronous>, transform_indices = @transform_1, window_bounds = array<i64: 64, 32>}, {pipeline_mode = #tpu.pipeline_mode<synchronous>, transform_indices = @transform_2, window_bounds = array<i64: 1, 64>}, {pipeline_mode = #tpu.pipeline_mode<synchronous>, transform_indices = @transform_3, window_bounds = array<i64: 32, 64>}, {pipeline_mode = #tpu.pipeline_mode<synchronous>, transform_indices = @transform_4, window_bounds = array<i64: 1, 32>}, {transform_indices = @transform_5, window_bounds = array<i64: 16, 32>}]} {
    %c0 = arith.constant 0 : index
    %c0_0 = arith.constant 0 : index
    %0 = vector.load %arg1[%c0, %c0_0] : memref<16x32xbf16, #tpu.memory_space<vmem>>, vector<16x32xbf16>
    %c0_1 = arith.constant 0 : index
    %c0_2 = arith.constant 0 : index
    %1 = vector.load %arg2[%c0_1, %c0_2] : memref<64x32xbf16, #tpu.memory_space<vmem>>, vector<64x32xbf16>
    %cst = arith.constant dense<0.000000e+00> : vector<16x64xf32>
    %2 = tpu.matmul %0, %1, %cst {dimension_numbers = #tpu.dot_dimension_numbers<[1], [1], [0], [0], [0, 0, 1, 0], [], []>} : vector<16x32xbf16>, vector<64x32xbf16>, vector<16x64xf32> -> vector<16x64xf32>
    %c0_3 = arith.constant 0 : index
    %c0_4 = arith.constant 0 : index
    %3 = vector.load %arg3[%c0_3, %c0_4] : memref<1x64xf32, #tpu.memory_space<vmem>>, vector<1x64xf32>
    %4 = vector.broadcast %3 : vector<1x64xf32> to vector<16x64xf32>
    %5 = arith.addf %2, %4 : vector<16x64xf32>
    %cst_5 = arith.constant 0.000000e+00 : f32
    %6 = vector.broadcast %cst_5 : f32 to vector<16x64xf32>
    %7 = arith.maximumf %5, %6 : vector<16x64xf32>
    %8 = arith.truncf %7 : vector<16x64xf32> to vector<16x64xbf16>
    %c0_6 = arith.constant 0 : index
    %c0_7 = arith.constant 0 : index
    %9 = vector.load %arg4[%c0_6, %c0_7] : memref<32x64xbf16, #tpu.memory_space<vmem>>, vector<32x64xbf16>
    %cst_8 = arith.constant dense<0.000000e+00> : vector<16x32xf32>
    %10 = tpu.matmul %8, %9, %cst_8 {dimension_numbers = #tpu.dot_dimension_numbers<[1], [1], [0], [0], [0, 0, 1, 0], [], []>} : vector<16x64xbf16>, vector<32x64xbf16>, vector<16x32xf32> -> vector<16x32xf32>
    %c0_9 = arith.constant 0 : index
    %c0_10 = arith.constant 0 : index
    %11 = vector.load %arg5[%c0_9, %c0_10] : memref<1x32xf32, #tpu.memory_space<vmem>>, vector<1x32xf32>
    %12 = vector.broadcast %11 : vector<1x32xf32> to vector<16x32xf32>
    %13 = arith.addf %10, %12 : vector<16x32xf32>
    %c0_11 = arith.constant 0 : index
    %c0_12 = arith.constant 0 : index
    %14 = vector.load %arg6[%c0_11, %c0_12] : memref<16x32xf32, #tpu.memory_space<vmem>>, vector<16x32xf32>
    tpu.vector_store %arg6[%c0_11, %c0_12], %13 {strides = array<i32>} : memref<16x32xf32, #tpu.memory_space<vmem>>, vector<16x32xf32>,
    return
  }
  func.func @transform_0(%arg0: i32) -> (i32, i32) {
    %c0_i32 = arith.constant 0 : i32
    %c0_i32_0 = arith.constant 0 : i32
    return %arg0, %c0_i32 : i32, i32
  }
  func.func @transform_1(%arg0: i32) -> (i32, i32) {
    %c0_i32 = arith.constant 0 : i32
    %c0_i32_0 = arith.constant 0 : i32
    %c0_i32_1 = arith.constant 0 : i32
    return %c0_i32, %c0_i32_0 : i32, i32
  }
  func.func @transform_2(%arg0: i32) -> (i32, i32) {
    %c0_i32 = arith.constant 0 : i32
    %c0_i32_0 = arith.constant 0 : i32
    %c0_i32_1 = arith.constant 0 : i32
    return %c0_i32, %c0_i32_0 : i32, i32
  }
  func.func @transform_3(%arg0: i32) -> (i32, i32) {
    %c0_i32 = arith.constant 0 : i32
    %c0_i32_0 = arith.constant 0 : i32
    %c0_i32_1 = arith.constant 0 : i32
    return %c0_i32, %c0_i32_0 : i32, i32
  }
  func.func @transform_4(%arg0: i32) -> (i32, i32) {
    %c0_i32 = arith.constant 0 : i32
    %c0_i32_0 = arith.constant 0 : i32
    %c0_i32_1 = arith.constant 0 : i32
    return %c0_i32, %c0_i32_0 : i32, i32
  }
  func.func @transform_5(%arg0: i32) -> (i32, i32) {
    %c0_i32 = arith.constant 0 : i32
    %c0_i32_0 = arith.constant 0 : i32
    return %arg0, %c0_i32 : i32, i32
  }
}

</mosaic_0001>

<bundles_post_ra>
// kernel: tpu_custom_call.1
= control target key start
LH: loop header
LB: loop body
LE: loop exit
PB: predicated region body
PF: predicated region fallthrough
CT: control target
= control target key end

     0   :  { %v287_v1 = vmov 0.0   ;;  %vm64_vm0 = vcmask 261120   ;;  %vm288_vm1 = vmmov 0   ;;  %vm145_vm2 = vcmask 523264   ;;  %s362_s0 = inlined_call_operand.vmem [shape: bf16[16,32], index: 0, kind: input, shape index: {}]   ;;  %s363_s1 = inlined_call_operand.vmem [shape: bf16[64,32], index: 1, kind: input, shape index: {}]   ;;  %s364_s2 = inlined_call_operand.vmem [shape: f32[1,64], index: 2, kind: input, shape index: {}]   ;;  %s365_s3 = inlined_call_operand.vmem [shape: bf16[32,64], index: 3, kind: input, shape index: {}]   ;;  %s366_s4 = inlined_call_operand.vmem [shape: f32[1,32], index: 4, kind: input, shape index: {}]   ;;  %s367_s5 = inlined_call_operand.hbm [shape: f32[16,32], index: 5, kind: output, shape index: {}]  }
   0x1   :  { %v258_v0 = vld [vmem:[%s363_s1 + $0x18] sm:$0xff]   ;;  %233 = vmatprep.subr.bf16.mxu0 %v287_v1  ;;  %245 = vmatprep.subr.bf16.mxu1 %v287_v1  ;;  %v259_v3 = vld [vmem:[%s363_s1 + $0x10] sm:$0xff]   ;;  %v263_v4 = vld [vmem:[%s365_s3 + $0x8] sm:$0xff]  }
   0x2   :  { %v78_v2 = vsel %vm64_vm0, %v258_v0, 0  ;;  %241 = vmatprep.mubr.msk.bf16.mxu0 %vm288_vm1, %v287_v1  ;;  %249 = vmatprep.mubr.msk.bf16.mxu1 %vm288_vm1, %v287_v1 }
   0x3   :  { %234 = vmatpush3.bf16.xpose.msra.mxu0 %v78_v2 }
   0x4   :  { %235 = vmatprep.subr.bf16.mxu0 %v287_v1 }
   0x5   :  { %10 = vsyncpa [#allocation3], 0  ;;  %v75_v5 = vsel %vm64_vm0, %v259_v3, 0  ;;  %v153_v6 = vsel %vm145_vm2, %v263_v4, 0  ;;  %v260_v7 = vld [vmem:[%s363_s1 + $0x8] sm:$0xff]   ;;  %v261_v9 = vld [vmem:[%s363_s1] sm:$0xff]  }
   0x6   :  { %246 = vmatpush3.bf16.xpose.msra.mxu1 %v153_v6  ;;  %v72_v8 = vsel %vm64_vm0, %v260_v7, 0  ;;  %v69_v10 = vsel %vm64_vm0, %v261_v9, 0  ;;  %v262_v11 = vld [vmem:[%s362_s0] sm:$0xff]  }
   0x7   :  { %247 = vmatprep.subr.bf16.mxu1 %v287_v1  ;;  %v264_v12 = vld [vmem:[%s365_s3] sm:$0xff]   ;;  %s289_s3 = smov [#allocation2]  }
   0x8   :  { %v150_v13 = vsel %vm145_vm2, %v264_v12, 0  ;;  %v214_v14 = vld [vmem:[%s364_s2] ss:$0 sm:$0xff]  ;;  %s203_s9 = sshll.u32 %s289_s3, 4  ;;  %s204_s9 = int_to_ptr.vmem [resolvable:$true] %s203_s9 }
   0x9   :  { %v221_v24 = vld [vmem:[%s366_s4] ss:$0 sm:$0xff]  ;;  %s265_s2 = scalar_lea.vmem %s204_s9, 256  ;;  %p270_p1 = scmp.lt.s32.totalorder %s204_s9, %s204_s9 }
   0xa   :  { %p266_p0 = scmp.ne.s32.totalorder %s204_s9, %s265_s2  ;;  %p271_p2 = scmp.lt.s32.totalorder %s265_s2, %s265_s2 }
   0xb   :  { %236 = vmatpush3.bf16.xpose.msra.mxu0 %v75_v5 }
   0xc   :  { %237 = vmatprep.subr.bf16.mxu0 %v287_v1  ;;  %p272_p3 = por %p271_p2, %p270_p1 }
   0xe   :  { %248 = vmatpush3.bf16.xpose.msra.mxu1 %v150_v13  ;;  %p273_p4 = pnand %p272_p3, %p266_p0 }
  0x13   :  { %238 = vmatpush3.bf16.xpose.msra.mxu0 %v72_v8 }
  0x14   :  { %239 = vmatprep.subr.bf16.mxu0 %v287_v1 }
  0x1b   :  { %240 = vmatpush3.bf16.xpose.msra.mxu0 %v69_v10 }
  0x22   :  { %242 = vmatmul.mubr.msk.bf16.vlgmr.msra.gmra.mxu0 %vm64_vm0, %v262_v11 }
  0xe2   :  { %v114_v15 = vpop.f32.mrf.mxu0 }
  0xe3   :  { %v115_v17 = vadd.f32 %v214_v14, %v114_v15 }
  0xe4   :  { %v243_v16 = vpop.f32.mrf.mxu0 }
  0xe5   :  { %v121_v21 = vmax.f32 %v115_v17, 0.0 }
  0xe6   :  { %v117_v18 = vpop.f32.mrf.mxu0 }
  0xe7   :  { %v118_v19 = vadd.f32 %v214_v14, %v117_v18 }
  0xe8   :  { %v244_v20 = vpop.f32.mrf.mxu0 }
  0xe9   :  { %v122_v22 = vmax.f32 %v118_v19, 0.0 }
  0xeb   :  { %v123_v23 = vpack.c.bf16 %v122_v22, %v121_v21 }
  0xed   :  { %250 = vmatmul.mubr.msk.bf16.vlgmr.msra.gmra.mxu1 %vm145_vm2, %v123_v23 }
 0x1ad   :  { %v189_v25 = vpop.f32.mrf.mxu1 }
 0x1ae   :  { %v190_v26 = vadd.f32 %v221_v24, %v189_v25 }
 0x1af   :  { %v251_v27 = vpop.f32.mrf.mxu1 }
 0x1b0   :  { %196 = vst.msk [vmem:[#allocation2] sm:$0xff] %vm64_vm0, %v190_v26 }
 0x1b1   :  { %v192_v28 = vpop.f32.mrf.mxu1 }
 0x1b2   :  { %v193_v29 = vadd.f32 %v221_v24, %v192_v28 }
 0x1b3   :  { %v252_v30 = vpop.f32.mrf.mxu1 }
 0x1b4   :  { %197 = vst.msk [vmem:[#allocation2 + $0x8] sm:$0xff] %vm64_vm0, %v193_v29 }
 0x1b5   :  { %276 = shalt.err (!%p273_p4)
}
 0x1b6   :  { %s290_s4 = smov 128   ;;  %s291_s10 = smov 8  }
 0x1b7   :  { %209 = dma.vmem_to_hbm [thread:$0]  %s204_s9, 256, %s367_s5, [#allocation3], %s290_s4, %s290_s4, %s291_s10  }
 0x1b8   :  { %285 = dma.done.wait [#allocation3], 256  }
 0x1b9   :  { %286 = vsyncadd [#allocation3], 4294967040 }
 0x1ba   :  { %213 = vsyncpa [#allocation3], 1 }

</bundles_post_ra>
